<compile_context>
chip_gen: v6e
topology: v6e:2x2x1
jax: 0.10.0
libtpu: 0.0.40
codegen_flags: <defaults>
</compile_context>

<pallas_src>
import math

import jax
import jax.numpy as jnp
import numpy as np
from jax.experimental import pallas as pl
from jax.experimental.pallas import tpu as pltpu


def _round_up(v, m):
    return ((v + m - 1) // m) * m


def _ffn_kernel(x_ref, w1_ref, b1_ref, w2_ref, b2_ref, out_ref, acc_ref):
    # x_ref  : (TM, dim)        f32   (tile of flattened tokens; resident over k)
    # w1_ref : (dim, TH)        bf16  (hidden-chunk of fc1 weight, x @ W layout)
    # b1_ref : (1, TH)          f32
    # w2_ref : (TH, dim)        bf16  (hidden-chunk of fc2 weight)
    # b2_ref : (1, dim)         f32
    # out_ref: (TM, dim)        out dtype
    # acc_ref: (TM, dim)        f32 scratch accumulator (resident over k)
    k = pl.program_id(1)

    @pl.when(k == 0)
    def _():
        acc_ref[...] = jnp.zeros_like(acc_ref)

    x = x_ref[...].astype(jnp.bfloat16)

    # fc1 chunk + bias + ReLU (f32 accumulate, f32 elementwise)
    h = jnp.dot(x, w1_ref[...], preferred_element_type=jnp.float32) + b1_ref[...]
    h = jnp.maximum(h, 0.0)

    # TODO(synk): dropout skipped here (identity in eval mode).

    # fc2 partial contraction over this hidden chunk.
    acc_ref[...] += jnp.dot(h.astype(jnp.bfloat16), w2_ref[...],
                            preferred_element_type=jnp.float32)

    @pl.when(k == pl.num_programs(1) - 1)
    def _():
        out_ref[...] = (acc_ref[...] + b2_ref[...]).astype(out_ref.dtype)


def prepare_params(params):
    """One-time prep (call OUTSIDE the per-forward path): bf16 weights, f32 biases."""
    w1, b1, w2, b2 = params
    return (w1.astype(jnp.bfloat16), b1.astype(jnp.float32),
            w2.astype(jnp.bfloat16), b2.astype(jnp.float32))


def _pick_hidden_tile(hidden, cap=512):
    """Largest 128-multiple divisor of `hidden` that is <= cap (else full hidden)."""
    if hidden <= cap:
        return hidden
    ht = (cap // 128) * 128
    while ht >= 128:
        if hidden % ht == 0:
            return ht
        ht -= 128
    return hidden


def positionwise_ffn(x, params, *, row_tile=256, hidden_tile=None, out_dtype=None):
    """x: (..., dim). params = (w1, b1, w2, b2) with
    w1: (dim, hidden), b1: (1, hidden), w2: (hidden, dim), b2: (1, dim).
    Weights ideally pre-cast to bf16 via prepare_params()."""
    w1, b1, w2, b2 = params
    dim = x.shape[-1]
    hidden = w1.shape[1]
    out_dtype = x.dtype if out_dtype is None else out_dtype

    # Prefer pre-cast weights (prepare_params); cast here only as a fallback.
    if w1.dtype != jnp.bfloat16:
        w1 = w1.astype(jnp.bfloat16)
    if w2.dtype != jnp.bfloat16:
        w2 = w2.astype(jnp.bfloat16)
    b1 = b1.astype(jnp.float32)
    b2 = b2.astype(jnp.float32)

    orig_shape = x.shape
    xf = x.reshape(-1, dim)                       # fold batch+seq -> token axis
    n_rows = xf.shape[0]

    # Fixed-cap row tile, 8-aligned; pad the token slab so it divides evenly.
    rt = max(8, min(int(row_tile), _round_up(n_rows, 8)))
    rt = _round_up(rt, 8)
    n_pad = _round_up(n_rows, rt)
    if n_pad != n_rows:
        xf = jnp.pad(xf, ((0, n_pad - n_rows), (0, 0)))

    # Hidden-chunk tiling (streams w1/w2 instead of keeping them fully resident).
    ht = hidden if hidden_tile is None else int(hidden_tile)
    if hidden_tile is None:
        ht = _pick_hidden_tile(hidden)
    if ht != hidden:
        assert hidden % ht == 0 and ht % 128 == 0, "hidden_tile must divide hidden and be a multiple of 128"
    n_rt = n_pad // rt
    n_ht = hidden // ht
    grid = (n_rt, n_ht)

    out_itemsize = jnp.dtype(out_dtype).itemsize

    # Explicit scoped-VMEM budget sized from the tiles (safe on v5e's 16 MiB
    # default and v7x's 64 MiB physical).
    est = (2 * rt * dim * 4                      # x tiles (double buffered)
           + 2 * rt * dim * out_itemsize         # out tiles
           + rt * dim * 4                        # f32 accumulator scratch
           + 2 * (dim * ht * 2 + ht * 4)         # w1 + b1 chunks
           + 2 * (ht * dim * 2)                  # w2 chunks
           + dim * 4)                            # b2 (single buffered)
    vmem_limit = int(min(max(4 * est, 16 * 1024 * 1024), 48 * 1024 * 1024))

    # Single-buffer operands whose block index never changes.
    const_mode = {"pipeline_mode": pl.Buffered(1)}
    weight_mode = const_mode if n_ht == 1 else {}

    cost = pl.CostEstimate(
        flops=4 * n_pad * dim * hidden,
        transcendentals=0,
        bytes_accessed=(n_pad * dim * 4                       # x read
                        + n_pad * dim * out_itemsize          # out write
                        + n_rt * (dim * hidden * 2            # w1 (re-read per row tile)
                                  + hidden * dim * 2          # w2
                                  + hidden * 4)               # b1
                        + dim * 4))                           # b2

    out = pl.pallas_call(
        _ffn_kernel,
        out_shape=jax.ShapeDtypeStruct((n_pad, dim), out_dtype),
        grid=grid,
        in_specs=[
            pl.BlockSpec((rt, dim), lambda i, k: (i, 0)),               # x tile (resident over k)
            pl.BlockSpec((dim, ht), lambda i, k: (0, k), **weight_mode),  # w1 chunk
            pl.BlockSpec((1, ht), lambda i, k: (0, k), **weight_mode),    # b1 chunk
            pl.BlockSpec((ht, dim), lambda i, k: (k, 0), **weight_mode),  # w2 chunk
            pl.BlockSpec((1, dim), lambda i, k: (0, 0), **const_mode),    # b2 (constant)
        ],
        out_specs=pl.BlockSpec((rt, dim), lambda i, k: (i, 0)),
        scratch_shapes=[pltpu.VMEM((rt, dim), jnp.float32)],
        compiler_params=pltpu.CompilerParams(
            dimension_semantics=("parallel", "arbitrary"),
            vmem_limit_bytes=vmem_limit),
        cost_estimate=cost,
    )(xf, w1, b1, w2, b2)

    return out[:n_rows].reshape(orig_shape)


def _reference(x, params):
    """Pure-JAX f32 replica of the PyTorch forward (dropout = identity)."""
    w1, b1, w2, b2 = params
    h = jnp.maximum(jnp.dot(x, w1) + b1, 0.0)
    return jnp.dot(h, w2) + b2


def _init_params(key, dim, hidden_dim):
    """Kaiming-normal weights (as in the PyTorch module), zero biases.
    Stored pre-transposed as (in, out) for x @ W."""
    k1, k2 = jax.random.split(key)
    w1 = jax.random.normal(k1, (dim, hidden_dim), jnp.float32) * math.sqrt(2.0 / dim)
    b1 = jnp.zeros((1, hidden_dim), jnp.float32)
    w2 = jax.random.normal(k2, (hidden_dim, dim), jnp.float32) * math.sqrt(2.0 / hidden_dim)
    b2 = jnp.zeros((1, dim), jnp.float32)
    return (w1, b1, w2, b2)


if __name__ == "__main__":
    # Small shapes; dim/hidden multiples of 128 keep loads/stores lane-dense.
    # S=20 (n_rows=40) deliberately exercises the padding path; hidden_tile=128
    # exercises the hidden-streaming accumulator path (2 chunks).
    B, S, DIM, HIDDEN = 2, 20, 128, 256

    key = jax.random.PRNGKey(0)
    kx, kp = jax.random.split(key)
    x = jax.random.normal(kx, (B, S, DIM), jnp.float32)
    params = _init_params(kp, DIM, HIDDEN)
    params_dev = prepare_params(params)      # one-time bf16 cast, outside the call path

    out = jax.block_until_ready(
        positionwise_ffn(x, params_dev, row_tile=16, hidden_tile=128))
    ref = jax.block_until_ready(_reference(x, params))

    assert out.shape == x.shape
    # bf16 MXU operands with f32 accumulation -> loosened tolerance vs f32 reference.
    np.testing.assert_allclose(np.asarray(out), np.asarray(ref), rtol=2e-2, atol=2e-2)

    print("KERNEL_OK")
</pallas_src>

<mosaic_0001>
module attributes {stable_mosaic.version = 11 : i64} {
  func.func @_ffn_kernel(%arg0: i32, %arg1: i32, %arg2: memref<16x128xf32, #tpu.memory_space<vmem>>, %arg3: memref<128x128xbf16, #tpu.memory_space<vmem>>, %arg4: memref<1x128xf32, #tpu.memory_space<vmem>>, %arg5: memref<128x128xbf16, #tpu.memory_space<vmem>>, %arg6: memref<1x128xf32, #tpu.memory_space<vmem>>, %arg7: memref<16x128xf32, #tpu.memory_space<vmem>>, %arg8: memref<16x128xf32, #tpu.memory_space<vmem>>) attributes {dimension_semantics = [#tpu.dimension_semantics<parallel>, #tpu.dimension_semantics<arbitrary>], iteration_bounds = array<i64: 3, 2>, scalar_prefetch = 0 : i64, scratch_operands = 1 : i64, tpu.core_type = #tpu.core_type<tc>, window_params = [{transform_indices = @transform_0, window_bounds = array<i64: 16, 128>}, {transform_indices = @transform_1, window_bounds = array<i64: 128, 128>}, {transform_indices = @transform_2, window_bounds = array<i64: 1, 128>}, {transform_indices = @transform_3, window_bounds = array<i64: 128, 128>}, {pipeline_mode = #tpu.pipeline_mode<synchronous>, transform_indices = @transform_4, window_bounds = array<i64: 1, 128>}, {transform_indices = @transform_5, window_bounds = array<i64: 16, 128>}]} {
    %c0_i32 = arith.constant 0 : i32
    %0 = arith.cmpi eq, %arg1, %c0_i32 : i32
    %1 = arith.extui %0 : i1 to i32
    %c0_i32_0 = arith.constant 0 : i32
    %2 = arith.cmpi ne, %1, %c0_i32_0 : i32
    scf.if %2 {
      %cst_15 = arith.constant 0.000000e+00 : f32
      %21 = vector.broadcast %cst_15 : f32 to vector<16x128xf32>
      %c0_16 = arith.constant 0 : index
      %c0_17 = arith.constant 0 : index
      %22 = vector.load %arg8[%c0_16, %c0_17] : memref<16x128xf32, #tpu.memory_space<vmem>>, vector<16x128xf32>
      tpu.vector_store %arg8[%c0_16, %c0_17], %21 {strides = array<i32>} : memref<16x128xf32, #tpu.memory_space<vmem>>, vector<16x128xf32>,
    } else {
    }
    %c0 = arith.constant 0 : index
    %c0_1 = arith.constant 0 : index
    %3 = vector.load %arg2[%c0, %c0_1] : memref<16x128xf32, #tpu.memory_space<vmem>>, vector<16x128xf32>
    %4 = arith.truncf %3 : vector<16x128xf32> to vector<16x128xbf16>
    %c0_2 = arith.constant 0 : index
    %c0_3 = arith.constant 0 : index
    %5 = vector.load %arg3[%c0_2, %c0_3] : memref<128x128xbf16, #tpu.memory_space<vmem>>, vector<128x128xbf16>
    %cst = arith.constant dense<0.000000e+00> : vector<16x128xf32>
    %6 = tpu.matmul %4, %5, %cst {dimension_numbers = #tpu.dot_dimension_numbers<[1], [0], [0], [1], [0, 0, 1, 1], [], []>} : vector<16x128xbf16>, vector<128x128xbf16>, vector<16x128xf32> -> vector<16x128xf32>
    %c0_4 = arith.constant 0 : index
    %c0_5 = arith.constant 0 : index
    %7 = vector.load %arg4[%c0_4, %c0_5] : memref<1x128xf32, #tpu.memory_space<vmem>>, vector<1x128xf32>
    %8 = vector.broadcast %7 : vector<1x128xf32> to vector<16x128xf32>
    %9 = arith.addf %6, %8 : vector<16x128xf32>
    %cst_6 = arith.constant 0.000000e+00 : f32
    %10 = vector.broadcast %cst_6 : f32 to vector<16x128xf32>
    %11 = arith.maximumf %9, %10 : vector<16x128xf32>
    %c0_7 = arith.constant 0 : index
    %c0_8 = arith.constant 0 : index
    %12 = vector.load %arg8[%c0_7, %c0_8] : memref<16x128xf32, #tpu.memory_space<vmem>>, vector<16x128xf32>
    %13 = arith.truncf %11 : vector<16x128xf32> to vector<16x128xbf16>
    %c0_9 = arith.constant 0 : index
    %c0_10 = arith.constant 0 : index
    %14 = vector.load %arg5[%c0_9, %c0_10] : memref<128x128xbf16, #tpu.memory_space<vmem>>, vector<128x128xbf16>
    %cst_11 = arith.constant dense<0.000000e+00> : vector<16x128xf32>
    %15 = tpu.matmul %13, %14, %cst_11 {dimension_numbers = #tpu.dot_dimension_numbers<[1], [0], [0], [1], [0, 0, 1, 1], [], []>} : vector<16x128xbf16>, vector<128x128xbf16>, vector<16x128xf32> -> vector<16x128xf32>
    %16 = arith.addf %12, %15 : vector<16x128xf32>
    %c0_12 = arith.constant 0 : index
    %c0_13 = arith.constant 0 : index
    %17 = vector.load %arg8[%c0_12, %c0_13] : memref<16x128xf32, #tpu.memory_space<vmem>>, vector<16x128xf32>
    tpu.vector_store %arg8[%c0_12, %c0_13], %16 {strides = array<i32>} : memref<16x128xf32, #tpu.memory_space<vmem>>, vector<16x128xf32>,
    %c1_i32 = arith.constant 1 : i32
    %18 = arith.cmpi eq, %arg1, %c1_i32 : i32
    %19 = arith.extui %18 : i1 to i32
    %c0_i32_14 = arith.constant 0 : i32
    %20 = arith.cmpi ne, %19, %c0_i32_14 : i32
    scf.if %20 {
      %c0_15 = arith.constant 0 : index
      %c0_16 = arith.constant 0 : index
      %21 = vector.load %arg8[%c0_15, %c0_16] : memref<16x128xf32, #tpu.memory_space<vmem>>, vector<16x128xf32>
      %c0_17 = arith.constant 0 : index
      %c0_18 = arith.constant 0 : index
      %22 = vector.load %arg6[%c0_17, %c0_18] : memref<1x128xf32, #tpu.memory_space<vmem>>, vector<1x128xf32>
      %23 = vector.broadcast %22 : vector<1x128xf32> to vector<16x128xf32>
      %24 = arith.addf %21, %23 : vector<16x128xf32>
      %c0_19 = arith.constant 0 : index
      %c0_20 = arith.constant 0 : index
      %25 = vector.load %arg7[%c0_19, %c0_20] : memref<16x128xf32, #tpu.memory_space<vmem>>, vector<16x128xf32>
      tpu.vector_store %arg7[%c0_19, %c0_20], %24 {strides = array<i32>} : memref<16x128xf32, #tpu.memory_space<vmem>>, vector<16x128xf32>,
    } else {
    }
    return
  }
  func.func @transform_0(%arg0: i32, %arg1: i32) -> (i32, i32) {
    %c0_i32 = arith.constant 0 : i32
    %c0_i32_0 = arith.constant 0 : i32
    return %arg0, %c0_i32 : i32, i32
  }
  func.func @transform_1(%arg0: i32, %arg1: i32) -> (i32, i32) {
    %c0_i32 = arith.constant 0 : i32
    %c0_i32_0 = arith.constant 0 : i32
    return %c0_i32, %arg1 : i32, i32
  }
  func.func @transform_2(%arg0: i32, %arg1: i32) -> (i32, i32) {
    %c0_i32 = arith.constant 0 : i32
    %c0_i32_0 = arith.constant 0 : i32
    return %c0_i32, %arg1 : i32, i32
  }
  func.func @transform_3(%arg0: i32, %arg1: i32) -> (i32, i32) {
    %c0_i32 = arith.constant 0 : i32
    %c0_i32_0 = arith.constant 0 : i32
    return %arg1, %c0_i32 : i32, i32
  }
  func.func @transform_4(%arg0: i32, %arg1: i32) -> (i32, i32) {
    %c0_i32 = arith.constant 0 : i32
    %c0_i32_0 = arith.constant 0 : i32
    %c0_i32_1 = arith.constant 0 : i32
    return %c0_i32, %c0_i32_0 : i32, i32
  }
  func.func @transform_5(%arg0: i32, %arg1: i32) -> (i32, i32) {
    %c0_i32 = arith.constant 0 : i32
    %c0_i32_0 = arith.constant 0 : i32
    return %arg0, %c0_i32 : i32, i32
  }
}

</mosaic_0001>

<bundles_post_ra>
// kernel: tpu_custom_call.1
= control target key start
LH: loop header
LB: loop body
LE: loop exit
PB: predicated region body
PF: predicated region fallthrough
CT: control target
= control target key end

     0   :  { %s1582_s0 = inlined_call_operand.hbm [shape: f32[48,128], index: 0, kind: input, shape index: {}]   ;;  %s1583_s1 = inlined_call_operand.hbm [shape: bf16[128,256], index: 1, kind: input, shape index: {}]   ;;  %s1584_s2 = inlined_call_operand.vmem [shape: f32[1,256], index: 2, kind: input, shape index: {}]   ;;  %s1585_s3 = inlined_call_operand.hbm [shape: bf16[256,128], index: 3, kind: input, shape index: {}]   ;;  %s1586_s4 = inlined_call_operand.vmem [shape: f32[1,128], index: 4, kind: input, shape index: {}]   ;;  %s1587_s5 = inlined_call_operand.hbm [shape: f32[48,128], index: 5, kind: output, shape index: {}]  }
   0x1   :  { %1601 = sst [smem:[#allocation22_spill]] %s1582_s0 }
   0x2   :  { %1602 = sst [smem:[#allocation23_spill]] %s1583_s1 }
   0x3   :  { %1603 = sst [smem:[#allocation24_spill]] %s1586_s4 }
   0x4   :  { %1604 = sst [smem:[#allocation25_spill]] %s1587_s5 }
   0x5   :  { %10 = vsyncpa [#allocation4], 0 }
   0x6   :  { %12 = vsyncpa [#allocation4 + $0x1], 0 }
   0x7   :  { %13 = vsyncpa [#allocation7], 0 }
   0x8   :  { %15 = vsyncpa [#allocation7 + $0x1], 0 }
   0x9   :  { %16 = vsyncpa [#allocation5], 0 }
   0xa   :  { %18 = vsyncpa [#allocation5 + $0x1], 0  ;;  %s1244_s18 = smov 0   ;;  %s1246_s19 = smov 0  }
   0xb   :  { %s1248_s20 = smov 0   ;;  %s1250_s21 = smov 0  }
   0xc   :  { %s1252_s22 = smov 0   ;;  %s1254_s23 = smov 0  }
   0xd   :  { %s1256_s24 = smov 0   ;;  %s1258_s25 = smov 0  }
   0xe   :  { %s1260_s26 = smov 0   ;;  %s1262_s27 = smov 0  }
   0xf   :  { %s1264_s28 = smov 0  }
  0x10 LB: > { %1605 = sst [smem:[#allocation13_spill]] %s1167_s20  ;;  %s33_s29 = sadd.s32 1, %s1191_s26  ;;  %s1199_s28 = sphi %s1264_s28, %s24_s28   ;;  %s1195_s27 = sphi %s1262_s27, %s1642_s27   ;;  %s1191_s26 = sphi %s1260_s26, %s1649_s26   ;;  %s1187_s25 = sphi %s1258_s25, %s1640_s25   ;;  %s1183_s24 = sphi %s1256_s24, %s1648_s24   ;;  %s1179_s23 = sphi %s1254_s23, %s1647_s23   ;;  %s1175_s22 = sphi %s1252_s22, %s1646_s22   ;;  %s1171_s21 = sphi %s1250_s21, %s1645_s21   ;;  %s1167_s20 = sphi %s1248_s20, %s1637_s20   ;;  %s1163_s19 = sphi %s1246_s19, %s1644_s19   ;;  %s1159_s18 = sphi %s1244_s18, %s1643_s18  }
  0x11   : > { %1606 = sst [smem:[#allocation14_spill]] %s1179_s23  ;;  %p51_p0 = scmp.eq.s32.totalorder %s1199_s28, 0 }
  0x12   : > { %1607 = sst [smem:[#allocation15_spill]] %s1187_s25  ;;  %p1301_p1 = scmp.ge.s32.totalorder %s33_s29, 2 }
  0x13   : > { %1608 = sst [smem:[#allocation16_spill]] %s1195_s27  ;;  %s69_s6 = sadd.s32 1, %s1167_s20 }
  0x14   : > { %p76_p2 = scmp.ne.s32.totalorder %s1167_s20, %s1163_s19  ;;  %p82_p3 = scmp.ne.s32.totalorder %s1163_s19, %s1159_s18 }
  0x15   : > { %s1651_s29 = smov (%p1301_p1, %s33_s29), 0  ;;  %p1593_p5 = scmp.lt.s32.totalorder %s1199_s28, 6 }
  0x16   : > { %1610 = sst [smem:[#allocation17_spill]] %s1651_s29  ;;  %p1316_p4 = por %p76_p2, %p51_p0 }
  0x17   : > { %s66_s8 = ssub.s32 %s1191_s26, %s1651_s29  ;;  %s229_s9 = sand.u32 1, %s1199_s28  }
  0x18   : > { %p67_p6 = scmp.eq.s32.totalorder %s66_s8, 0  ;;  %s231_s10 = sand.u32 1, %s1167_s20  }
  0x19   : > { %s1328_s12 = sshll.u32 %s231_s10, 6  ;;  %s759_s13 = sshll.u32 %s1191_s26, 6 }
  0x1a   : > { %s1326_s11 = scalar_select %p67_p6, %s1167_s20, %s69_s6  }
  0x1b   : > { %s1613_s1 = sld [smem:[#allocation23_spill]]  ;;  %s233_s17 = scalar_lea.vmem [#allocation6], %s1328_s12 }
  0x1c   : > { %1612 = sst [smem:[#allocation18_spill]] %s1326_s11  ;;  %s239_s5 = sshll.u32 %s233_s17, 4  ;;  %s240_s5 = int_to_ptr.vmem [resolvable:$true] %s239_s5 }
  0x1d   : > { %p1339_p7 = pnand %p1593_p5, %p1316_p4  ;;  %p763_p8 = scmp.ge.s32.totalorder %s1199_s28, 1 }
  0x1e   : > { %s1344_s6 = scalar_lea.sflag [#allocation7], %s229_s9  ;;  %s1004_s8 = scalar_lea.vmem %s240_s5, 1024 }
  0x1f   : > { %p1592_p9 = pneg %p1339_p7  ;;  %p1005_p10 = scmp.ne.s32.totalorder %s240_s5, %s1004_s8 }
  0x20   : > { %s1201_s10 = smov [#allocation6]  }
  0x21   : > { %s238_s16 = scalar_lea.hbm %s1613_s1, %s759_s13  ;;  %p1007_p11 = pnand %p1005_p10, %p1592_p9 }
  0x22   : > { %s1009_s7 = sshll.u32 %s1201_s10, 4  ;;  %s1010_s7 = int_to_ptr.vmem [resolvable:$false] %s1009_s7 }
  0x23   : > { %p1008_p12 = pneg %p1007_p11  ;;  %s1011_s13 = scalar_lea.vmem %s1010_s7, 2048 }
  0x24   : > { %p1012_p13 = scmp.lt.s32.totalorder %s240_s5, %s1010_s7  ;;  %p1013_p2 = scmp.lt.s32.totalorder %s1011_s13, %s1004_s8 }
  0x26   : > { %p1014_p4 = por %p1013_p2, %p1012_p13 }
  0x28   : > { %p1015_p6 = pnand %p1014_p4, %p1008_p12 }
  0x2a   : > { %1018 = shalt.err (!%p1015_p6)
}
  0x2b   : > { %s1594_s14 = smov 128   ;;  %s1590_s9 = smov 64  }
  0x2c   : > { %s1591_s15 = smov 4   ;;  %p274_p10 = scmp.lt.s32.totalorder %s1199_s28, 7 }
  0x2d   : > { %868 = dma.hbm_to_vmem [thread:$0]  (!%p1339_p7), %s238_s16, 1024, %s240_s5, %s1344_s6, %s1594_s14, %s1590_s9, %s1591_s15  }
  0x2e   : > { %p1360_p11 = pnand %p763_p8, %p274_p10  ;;  %s1365_s8 = sadd.s32 4294967295, %s1199_s28  }
  0x2f   : > { %s752_s10 = sadd.s32 4294967294, %s1199_s28   ;;  %s36_s7 = sadd.s32 1, %s1195_s27 }
  0x30   : > { %s43_s13 = sadd.s32 1, %s1179_s23  ;;  %s1653_s7 = smov (!%p1301_p1, %s36_s7), %s1195_s27 }
  0x31   : > { %p50_p12 = scmp.ne.s32.totalorder %s1179_s23, %s1175_s22  ;;  %p56_p13 = scmp.ne.s32.totalorder %s1175_s22, %s1171_s21 }
  0x32   : > { %p38_p8 = scmp.ge.s32.totalorder %s1653_s7, 3  ;;  %p57_p2 = scmp.eq.s32.totalorder %s1365_s8, 0 }
  0x33   : > { %p1380_p4 = por %p51_p0, %p50_p12  ;;  %p179_p6 = scmp.eq.s32.totalorder %s1365_s8, 5 }
  0x34   : > { %s1655_s7 = smov (%p38_p8, %s1653_s7), 0  ;;  %p1390_p1 = por %p57_p2, %p56_p13 }
  0x35   : > { %1617 = sst [smem:[#allocation19_spill]] %s1655_s7  ;;  %p1397_p10 = por %p82_p3, %p57_p2 }
  0x36   : > { %s40_s9 = ssub.s32 %s1195_s27, %s1655_s7  ;;  %p1403_p0 = por %p179_p6, %p50_p12 }
  0x37   : > { %p41_p9 = scmp.eq.s32.totalorder %s40_s9, 0  ;;  %p185_p5 = scmp.eq.s32.totalorder %s752_s10, 5 }
  0x38   : > { %s1620_s15 = scalar_select %p1403_p0, 1, 0 }
  0x39   : > { %s208_s14 = sand.u32 1, %s1179_s23   ;;  %s793_s1 = sshll.u32 %s1195_s27, 8 }
  0x3a   : > { %1621 = sst [smem:[#allocation20_spill]] %s1620_s15  ;;  %p1415_p8 = por %p185_p5, %p56_p13 }
  0x3b   : > { %s1410_s11 = scalar_select %p41_p9, %s1179_s23, %s43_s13  }
  0x3c   : > { %s1623_s20 = scalar_select %p1415_p8, 1, 0 }
  0x3d   : > { %1622 = sst [smem:[#allocation21_spill]] %s1410_s11  ;;  %s755_s18 = sshll.u32 %s208_s14, 4 }
  0x3e   : > { %s1624_s0 = sld [smem:[#allocation22_spill]]  ;;  %p1625_p3 = scmp.lt.s32.totalorder %s1199_s28, 6 }
  0x3f   : > { %s212_s9 = scalar_lea.vmem [#allocation3], %s755_s18  ;;  %s209_s13 = scalar_lea.sflag [#allocation4], %s208_s14 }
  0x40   : > { %p1426_p12 = pnand %p1625_p3, %p1380_p4  ;;  %s219_s10 = sshll.u32 %s212_s9, 4  ;;  %s220_s10 = int_to_ptr.vmem [resolvable:$true] %s219_s10 }
  0x41   : > { %s1032_s27 = scalar_lea.vmem %s220_s10, 256  ;;  %s1205_s11 = smov [#allocation3]  }
  0x42   : > { %p1021_p5 = pneg %p1426_p12  ;;  %p1033_p9 = scmp.ne.s32.totalorder %s220_s10, %s1032_s27 }
  0x43   : > { %s1037_s4 = sshll.u32 %s1205_s11, 4  ;;  %s1038_s4 = int_to_ptr.vmem [resolvable:$false] %s1037_s4 }
  0x44   : > { %s218_s7 = scalar_lea.hbm %s1624_s0, %s793_s1  ;;  %p1035_p13 = pnand %p1033_p9, %p1021_p5 }
  0x45   : > { %s1039_s1 = scalar_lea.vmem %s1038_s4, 512  ;;  %p1040_p6 = scmp.lt.s32.totalorder %s220_s10, %s1038_s4 }
  0x46   : > { %p1036_p2 = pneg %p1035_p13  ;;  %p1041_p4 = scmp.lt.s32.totalorder %s1039_s1, %s1032_s27 }
  0x48   : > { %p1042_p3 = por %p1041_p4, %p1040_p6 }
  0x4a   : > { %p1043_p8 = pnand %p1042_p3, %p1036_p2 }
  0x4c   : > { %1046 = shalt.err (!%p1043_p8)
}
  0x4d   : > { %s1206_s25 = smov 8   ;;  %s1627_s5 = smov 128  }
  0x4e   : > { %865 = dma.hbm_to_vmem [thread:$0]  (!%p1426_p12), %s218_s7, 256, %s220_s10, %s209_s13, %s1627_s5, %s1627_s5, %s1206_s25  }
  0x4f   : > { %s794_s14 = sshll.u32 %s1191_s26, 10  ;;  %s259_s0 = scalar_lea.vmem [#allocation8], %s1328_s12 }
  0x50   : > { %s265_s11 = scalar_lea.hbm %s1585_s3, %s794_s14  ;;  %s266_s4 = sshll.u32 %s259_s0, 4  ;;  %s267_s4 = int_to_ptr.vmem [resolvable:$true] %s266_s4 }
  0x51   : > { %s1060_s27 = scalar_lea.vmem %s267_s4, 1024  ;;  %p1628_p8 = pneg %p1339_p7 }
  0x52   : > { %p1061_p5 = scmp.ne.s32.totalorder %s267_s4, %s1060_s27  ;;  %s1207_s15 = smov [#allocation8]  }
  0x53   : > { %s1065_s1 = sshll.u32 %s1207_s15, 4  ;;  %s1066_s1 = int_to_ptr.vmem [resolvable:$false] %s1065_s1 }
  0x54   : > { %p1063_p9 = pnand %p1061_p5, %p1628_p8  ;;  %s1067_s23 = scalar_lea.vmem %s1066_s1, 2048 }
  0x55   : > { %p1068_p2 = scmp.lt.s32.totalorder %s267_s4, %s1066_s1  ;;  %p1069_p12 = scmp.lt.s32.totalorder %s1067_s23, %s1060_s27 }
  0x56   : > { %p1064_p13 = pneg %p1063_p9 }
  0x57   : > { %p1070_p6 = por %p1069_p12, %p1068_p2 }
  0x59   : > { %p1071_p4 = pnand %p1070_p6, %p1064_p13 }
  0x5b   : > { %1074 = shalt.err (!%p1071_p4)
}
  0x5c   : > { %s1629_s12 = smov 4   ;;  %s1630_s0 = smov 64  }
  0x5d   : > { %871 = dma.hbm_to_vmem [thread:$0]  (!%p1339_p7), %s265_s11, 1024, %s267_s4, %s1344_s6, %s1630_s0, %s1630_s0, %s1629_s12  }
  0x5e   : > { %278 = sbr.rel (%p1360_p11) target bundleno = 585 (0x249), region = 40  ;;  %s1453_s7 = sand.u32 (!%p1360_p11), 1, %s1175_s22  }
  0x5f   : > { %s764_s23 = sshll.u32 (!%p1360_p11), %s1453_s7, 4  ;;  %s281_s10 = scalar_lea.sflag (!%p1360_p11), [#allocation4], %s1453_s7 }
  0x60   : > { %s1457_s13 = scalar_lea.vmem (!%p1360_p11), [#allocation3], %s764_s23 }
  0x63   : > { %1146 = dma.done.wait (%p1390_p1), %s281_s10, 256  }
  0x64   : > { %1148 = vsyncadd (%p1390_p1), %s281_s10, 4294967040  ;;  %s289_s29 = sand.u32 1, %s1365_s8   ;;  %s291_s6 = sand.u32 1, %s1163_s19  }
  0x65   : > { %s765_s17 = sshll.u32 %s291_s6, 6  ;;  %s290_s25 = scalar_lea.sflag [#allocation7], %s289_s29 }
  0x66   : > { %s1465_s5 = scalar_lea.vmem [#allocation6], %s765_s17 }
  0x67   : > { %1150 = dma.done.wait (%p1397_p10), %s290_s25, 2048  }
  0x68   : > { %1152 = vsyncadd (%p1397_p10), %s290_s25, 4294965248  ;;  %p343_p7 = scmp.lt.s32.totalorder %s1183_s24, 1  ;;  %s1479_s9 = scalar_lea.vmem [#allocation8], %s765_s17 }
  0x69   : > { %s1481_s11 = scalar_lea.vmem [#allocation9], %s764_s23  ;;  %p768_p11 = scmp.ne.s32.totalorder %s1183_s24, 0 }
  0x6a   : > { %s1473_s14 = scalar_select %p343_p7, %s1183_s24, 1 }
  0x6b   : > { %352 = sbr.rel (%p768_p11) target bundleno = 114 (0x72), region = 56 }
  0x6c   : > { %s345_s8 = scalar_lea.vmem %s1584_s2, %s1473_s14 }
  0x70   : > { %v1208_v0 = vmov 0.0  }
  0x71   : > { %353 = vst [vmem:[#allocation2] sm:$0xff] %v1208_v0  ;;  %354 = vst [vmem:[#allocation2 + $0x8] sm:$0xff] %v1208_v0 }
  0x72 PF: > { %v975_v1 = vld [vmem:[%s1465_s5 + $0x38] sm:$0xff]   ;;  %v1209_v2 = vmov 0.0   ;;  %v976_v3 = vld [vmem:[%s1465_s5 + $0x30] sm:$0xff]   ;;  %vm1210_vm0 = vmmov 0   ;;  %v977_v4 = vld [vmem:[%s1465_s5 + $0x28] sm:$0xff]   ;;  %p786_p1 = scmp.ne.s32.totalorder %s1183_s24, 1 }
  0x73   : > { %814 = vmatprep.subr.bf16.mxu0 %v1209_v2  ;;  %834 = vmatprep.subr.bf16.mxu1 %v1209_v2  ;;  %v983_v5 = vld [vmem:[%s1479_s9 + $0x38] sm:$0xff]   ;;  %v978_v6 = vld [vmem:[%s1465_s5 + $0x20] sm:$0xff]   ;;  %v984_v7 = vld [vmem:[%s1479_s9 + $0x30] sm:$0xff]   ;;  %s1631_s1 = sld [smem:[#allocation24_spill]] (!%p786_p1) }
  0x74   : > { %815 = vmatpush3.bf16.msra.mxu0 %v975_v1  ;;  %830 = vmatprep.mubr.msk.bf16.mxu0 %vm1210_vm0, %v1209_v2  ;;  %v979_v8 = vld [vmem:[%s1465_s5 + $0x18] sm:$0xff]   ;;  %v985_v9 = vld [vmem:[%s1479_s9 + $0x28] sm:$0xff]   ;;  %v980_v10 = vld [vmem:[%s1465_s5 + $0x10] sm:$0xff]  }
  0x75   : > { %816 = vmatprep.subr.bf16.mxu0 %v1209_v2  ;;  %850 = vmatprep.mubr.msk.bf16.mxu1 %vm1210_vm0, %v1209_v2  ;;  %v986_v11 = vld [vmem:[%s1479_s9 + $0x20] sm:$0xff]   ;;  %v981_v12 = vld [vmem:[%s1465_s5 + $0x8] sm:$0xff]   ;;  %v987_v13 = vld [vmem:[%s1479_s9 + $0x18] sm:$0xff]  }
  0x76   : > { %835 = vmatpush3.bf16.msra.mxu1 %v983_v5  ;;  %v982_v14 = vld [vmem:[%s1465_s5] sm:$0xff]   ;;  %v356_v16 = vld [vmem:[%s1457_s13 + $0x8] sm:$0xff]  ;;  %v988_v18 = vld [vmem:[%s1479_s9 + $0x10] sm:$0xff]  }
  0x77   : > { %836 = vmatprep.subr.bf16.mxu1 %v1209_v2  ;;  %v355_v15 = vld [vmem:[%s1457_s13] sm:$0xff]  ;;  %v989_v19 = vld [vmem:[%s1479_s9 + $0x8] sm:$0xff]  }
  0x78   : > { %817 = vmatpush3.bf16.msra.mxu0 %v976_v3  ;;  %v357_v17 = vpack.c.bf16 %v356_v16, %v355_v15  ;;  %v990_v20 = vld [vmem:[%s1479_s9] sm:$0xff]   ;;  %v769_v21 = vld [vmem:[%s345_s8] ss:$0 sm:$0xff]  ;;  %v473_v35 = vld [vmem:[#allocation2 + $0x8] sm:$0xff] }
  0x79   : > { %818 = vmatprep.subr.bf16.mxu0 %v1209_v2  ;;  %v472_v31 = vld [vmem:[#allocation2] sm:$0xff] }
  0x7a   : > { %837 = vmatpush3.bf16.msra.mxu1 %v984_v7 }
  0x7b   : > { %838 = vmatprep.subr.bf16.mxu1 %v1209_v2 }
  0x7c   : > { %819 = vmatpush3.bf16.msra.mxu0 %v977_v4 }
  0x7d   : > { %820 = vmatprep.subr.bf16.mxu0 %v1209_v2 }
  0x7e   : > { %839 = vmatpush3.bf16.msra.mxu1 %v985_v9 }
  0x7f   : > { %840 = vmatprep.subr.bf16.mxu1 %v1209_v2 }
  0x80   : > { %821 = vmatpush3.bf16.msra.mxu0 %v978_v6 }
  0x81   : > { %822 = vmatprep.subr.bf16.mxu0 %v1209_v2 }
  0x82   : > { %841 = vmatpush3.bf16.msra.mxu1 %v986_v11 }
  0x83   : > { %842 = vmatprep.subr.bf16.mxu1 %v1209_v2 }
  0x84   : > { %823 = vmatpush3.bf16.msra.mxu0 %v979_v8 }
  0x85   : > { %824 = vmatprep.subr.bf16.mxu0 %v1209_v2 }
  0x86   : > { %843 = vmatpush3.bf16.msra.mxu1 %v987_v13 }
  0x87   : > { %844 = vmatprep.subr.bf16.mxu1 %v1209_v2 }
  0x88   : > { %825 = vmatpush3.bf16.msra.mxu0 %v980_v10 }
  0x89   : > { %826 = vmatprep.subr.bf16.mxu0 %v1209_v2 }
  0x8a   : > { %845 = vmatpush3.bf16.msra.mxu1 %v988_v18 }
  0x8b   : > { %846 = vmatprep.subr.bf16.mxu1 %v1209_v2 }
  0x8c   : > { %827 = vmatpush3.bf16.msra.mxu0 %v981_v12 }
  0x8d   : > { %828 = vmatprep.subr.bf16.mxu0 %v1209_v2 }
  0x8e   : > { %847 = vmatpush3.bf16.msra.mxu1 %v989_v19 }
  0x8f   : > { %848 = vmatprep.subr.bf16.mxu1 %v1209_v2 }
  0x90   : > { %829 = vmatpush3.bf16.msra.mxu0 %v982_v14 }
  0x92   : > { %849 = vmatpush3.bf16.msra.mxu1 %v990_v20 }
  0x93   : > { %831 = vmatmul.mubr.bf16.vlgmr.msra.gmra.mxu0 %v357_v17 }
 0x153   : > { %v463_v22 = vpop.f32.mrf.mxu0 }
 0x154   : > { %v464_v24 = vadd.f32 %v769_v21, %v463_v22 }
 0x155   : > { %v832_v23 = vpop.f32.mrf.mxu0 }
 0x156   : > { %v470_v28 = vmax.f32 %v464_v24, 0.0 }
 0x157   : > { %v466_v25 = vpop.f32.mrf.mxu0 }
 0x158   : > { %v467_v26 = vadd.f32 %v769_v21, %v466_v25 }
 0x159   : > { %v833_v27 = vpop.f32.mrf.mxu0 }
 0x15a   : > { %v471_v29 = vmax.f32 %v467_v26, 0.0 }
 0x15c   : > { %v474_v30 = vpack.c.bf16 %v471_v29, %v470_v28 }
 0x15e   : > { %851 = vmatmul.mubr.bf16.vlgmr.msra.gmra.mxu1 %v474_v30 }
 0x21e   : > { %v573_v32 = vpop.f32.mrf.mxu1 }
 0x21f   : > { %v580_v33 = vadd.f32 %v573_v32, %v472_v31 }
 0x220   : > { %v852_v34 = vpop.f32.mrf.mxu1 }
 0x221   : > { %582 = vst [vmem:[#allocation2] sm:$0xff] %v580_v33  ;;  %587 = sbr.rel (%p786_p1) target bundleno = 560 (0x230), region = 60 }
 0x222   : > { %v576_v36 = vpop.f32.mrf.mxu1 }
 0x223   : > { %v581_v37 = vadd.f32 %v576_v36, %v473_v35 }
 0x224   : > { %v853_v38 = vpop.f32.mrf.mxu1 }
 0x225   : > { %583 = vst [vmem:[#allocation2 + $0x8] sm:$0xff] %v581_v37 }
 0x226   : > { %v787_v40 = vld [vmem:[%s1631_s1] ss:$0 sm:$0xff] }
 0x228   : > { %v588_v39 = vld [vmem:[#allocation2] sm:$0xff] }
 0x229   : > { %v597_v42 = vadd.f32 %v787_v40, %v588_v39 }
 0x22b   : > { %599 = vst [vmem:[%s1481_s11] sm:$0xff] %v597_v42 }
 0x22c   : > { %v589_v41 = vld [vmem:[#allocation2 + $0x8] sm:$0xff] }
 0x22d   : > { %v598_v43 = vadd.f32 %v787_v40, %v589_v41 }
 0x22f   : > { %600 = vst [vmem:[%s1481_s11 + $0x8] sm:$0xff] %v598_v43 }
 0x230 PF: > { %s1632_s12 = sld [smem:[#allocation15_spill]]  ;;  %s615_s6 = sshll.u32 %s1481_s11, 4  ;;  %s1520_s6 = int_to_ptr.vmem [resolvable:$true] %s615_s6 }
 0x231   : > { %s1634_s13 = sld [smem:[#allocation25_spill]]  ;;  %s602_s17 = scalar_lea.sflag [#allocation5], %s1453_s7 }
 0x232   : > { %s1075_s25 = scalar_lea.vmem %s1520_s6, 256  ;;  %s1211_s5 = smov [#allocation9]  }
 0x233   : > { %p1076_p10 = scmp.ne.s32.totalorder %s1520_s6, %s1075_s25  ;;  %s1079_s14 = sshll.u32 %s1211_s5, 4  ;;  %s1080_s14 = int_to_ptr.vmem [resolvable:$false] %s1079_s14 }
 0x234   : > { %s1081_s30 = scalar_lea.vmem %s1080_s14, 512  ;;  %p1082_p8 = scmp.lt.s32.totalorder %s1520_s6, %s1080_s14 }
 0x235   : > { %p1077_p3 = pnand %p1076_p10, %p1403_p0  ;;  %p1083_p9 = scmp.lt.s32.totalorder %s1081_s30, %s1075_s25 }
 0x236   : > { %s795_s23 = sshll.u32 %s1632_s12, 8 }
 0x237   : > { %s1517_s29 = scalar_lea.hbm %s1634_s13, %s795_s23  ;;  %p1078_p5 = pneg %p1077_p3 }
 0x238   : > { %p1084_p13 = por %p1083_p9, %p1082_p8 }
 0x23a   : > { %p1085_p2 = pnand %p1084_p13, %p1078_p5 }
 0x23c   : > { %1088 = shalt.err (!%p1085_p2)
}
 0x23d   : > { %s1089_s18 = scalar_lea.hbm %s1517_s29, 256  ;;  %s1093_s11 = scalar_lea.hbm %s1634_s13, 768 }
 0x23e   : > { %p1090_p12 = scmp.ne.s32.totalorder %s1517_s29, %s1089_s18  ;;  %p1094_p7 = scmp.lt.s32.totalorder %s1517_s29, %s1634_s13 }
 0x23f   : > { %p1095_p11 = scmp.lt.s32.totalorder %s1093_s11, %s1089_s18 }
 0x240   : > { %p1091_p6 = pnand %p1090_p12, %p1403_p0 }
 0x241   : > { %p1096_p1 = por %p1095_p11, %p1094_p7 }
 0x242   : > { %p1092_p4 = pneg %p1091_p6 }
 0x244   : > { %p1097_p10 = pnand %p1096_p1, %p1092_p4 }
 0x246   : > { %1100 = shalt.err (!%p1097_p10)
}
 0x247   : > { %s1212_s27 = smov 128   ;;  %s1213_s15 = smov 8  }
 0x248   : > { %860 = dma.vmem_to_hbm [thread:$0]  (%p1403_p0), %s1520_s6, 256, %s1517_s29, %s602_s17, %s1212_s27, %s1212_s27, %s1213_s15  }
 0x249 PF: > { %p877_p3 = scmp.ge.s32.totalorder %s1199_s28, 2  ;;  %s630_s1 = sand.u32 1, %s1171_s21  }
 0x24a   : > { %p1635_p5 = scmp.ne.s32.totalorder %s1623_s20, 0  ;;  %s631_s12 = scalar_lea.sflag [#allocation5], %s630_s1 }
 0x24c   : > { %p873_p8 = pnand %p877_p3, %p1635_p5 }
 0x24e   : > { %p874_p9 = pneg %p873_p8 }
 0x250   : > { %1154 = dma.done.wait (%p874_p9), %s631_s12, 256  }
 0x251   : > { %1156 = vsyncadd (%p874_p9), %s631_s12, 4294967040  ;;  %s24_s28 = sadd.s32 1, %s1199_s28   ;;  %s1636_s23 = sld [smem:[#allocation13_spill]] }
 0x252   : > { %p21_p13 = scmp.ge.s32.totalorder %s24_s28, 8   ;;  %s1637_s20 = sld [smem:[#allocation18_spill]] }
 0x253   : > { %s1638_s7 = sld [smem:[#allocation14_spill]]  ;;  %s1643_s18 = smov %s1163_s19 }
 0x254   : > { %s1639_s0 = sld [smem:[#allocation21_spill]]  ;;  %s1645_s21 = smov %s1175_s22 }
 0x255   : > { %s1640_s25 = sld [smem:[#allocation16_spill]]  ;;  %s1648_s24 = smov %s1191_s26 }
 0x256   : > { %s1641_s10 = sld [smem:[#allocation17_spill]] }
 0x257   : > { %s1642_s27 = sld [smem:[#allocation19_spill]]  ;;  %s1644_s19 = smov %s1636_s23 }
 0x258   :  { %23 = sbr.rel (!%p21_p13) target bundleno = 16 (0x10), region = 120 }
 0x259   : > { %s1646_s22 = smov %s1638_s7 }
 0x25a   : > { %s1647_s23 = smov %s1639_s0 }
 0x25c   : > { %s1649_s26 = smov %s1641_s10 }
 0x25d   :  { %636 = vsyncpa [#allocation4], 1 }
 0x25e   :  { %638 = vsyncpa [#allocation4 + $0x1], 1 }
 0x25f   :  { %639 = vsyncpa [#allocation7], 1 }
 0x260   :  { %641 = vsyncpa [#allocation7 + $0x1], 1 }
 0x261   :  { %642 = vsyncpa [#allocation5], 1 }
 0x262   :  { %644 = vsyncpa [#allocation5 + $0x1], 1 }

</bundles_post_ra>
